<compile_context>
chip_gen: v6e
topology: v6e:2x2x1
jax: 0.10.0
libtpu: 0.0.40
codegen_flags: <defaults>
</compile_context>

<pallas_src>
import jax
import jax.numpy as jnp
from jax.experimental import pallas as pl
from jax.experimental.pallas import tpu as pltpu


def autoencoder_kernel(x_ref, w1_ref, b1_ref, w2_ref, b2_ref,
                       enc_ref, dec_ref):
    # encoded = relu(x @ W1^T + b1)
    x = x_ref[...]
    h = jnp.dot(x, w1_ref[...], preferred_element_type=jnp.float32)
    h = h + b1_ref[...]                       # (1, out) broadcasts over batch tile
    encoded = jnp.maximum(h, 0.0)
    enc_ref[...] = encoded.astype(enc_ref.dtype)

    # decoded = sigmoid(encoded @ W2^T + b2)   (encoded never leaves VMEM here)
    d = jnp.dot(encoded, w2_ref[...], preferred_element_type=jnp.float32)
    d = d + b2_ref[...]
    dec_ref[...] = jax.nn.sigmoid(d).astype(dec_ref.dtype)


def _round_up(n, m):
    return ((n + m - 1) // m) * m


def autoencoder_forward(x, w1, b1, w2, b2, *, tile_b=256):
    """Forward pass of the AutoEncoder module.

    x:  (B, inputsize)
    w1: (outputsize, inputsize), b1: (outputsize,)   -- PyTorch nn.Linear layout
    w2: (inputsize, outputsize), b2: (inputsize,)
    Returns (encoded (B, outputsize), decoded (B, inputsize)).
    """
    B, in_dim = x.shape
    out_dim = w1.shape[0]
    dtype = x.dtype
    itemsize = jnp.dtype(dtype).itemsize

    # ---- batch-tile selection ------------------------------------------------
    #  * as large as requested (default 256) to amortize per-step overhead,
    #  * but no larger than ~half the batch (rounded up to 8 sublanes) so the
    #    parallel grid has >=2 steps when possible (v7x dual TensorCore),
    #  * and at least 8 rows (f32 sublane granularity).
    tb = min(int(tile_b), _round_up(pl.cdiv(B, 2), 8))
    tb = max(tb, 8)

    grid_b = pl.cdiv(B, tb)
    b_pad = grid_b * tb
    if b_pad != B:
        # Zero-pad the tail tile; padded rows are computed then dropped below.
        x = jnp.pad(x, ((0, b_pad - B), (0, 0)))

    # Pre-transpose weights (plain-JAX glue) so kernel matmuls are row-major.
    w1t = w1.T                       # (in_dim, out_dim)
    w2t = w2.T                       # (out_dim, in_dim)
    b1r = b1.reshape(1, out_dim)
    b2r = b2.reshape(1, in_dim)

    # ---- cost estimate & VMEM bookkeeping -------------------------------------
    flops = 4 * b_pad * in_dim * out_dim            # two (b, in, out) matmuls
    transcendentals = b_pad * in_dim                # exp() inside sigmoid
    bytes_accessed = itemsize * (
        b_pad * in_dim                              # x
        + 2 * in_dim * out_dim + in_dim + out_dim   # weights + biases
        + b_pad * out_dim + b_pad * in_dim)         # encoded + decoded
    cost = pl.CostEstimate(flops=flops,
                           transcendentals=transcendentals,
                           bytes_accessed=bytes_accessed)

    # Double-buffered activation tiles + double-buffered (constant) weights.
    vmem_est = (2 * tb * (2 * in_dim + out_dim)
                + 2 * (2 * in_dim * out_dim + in_dim + out_dim)) * itemsize
    # Only raise the scoped limit if we'd get near v5e's 16 MiB default.
    vmem_limit = int(vmem_est + (8 << 20)) if vmem_est > (12 << 20) else None

    enc_shape = jax.ShapeDtypeStruct((b_pad, out_dim), dtype)
    dec_shape = jax.ShapeDtypeStruct((b_pad, in_dim), dtype)

    encoded, decoded = pl.pallas_call(
        autoencoder_kernel,
        out_shape=(enc_shape, dec_shape),
        grid_spec=pltpu.PrefetchScalarGridSpec(
            num_scalar_prefetch=0,
            grid=(grid_b,),
            in_specs=[
                pl.BlockSpec((tb, in_dim), lambda i: (i, 0)),       # x tile
                pl.BlockSpec((in_dim, out_dim), lambda i: (0, 0)),  # W1^T (resident)
                pl.BlockSpec((1, out_dim), lambda i: (0, 0)),       # b1
                pl.BlockSpec((out_dim, in_dim), lambda i: (0, 0)),  # W2^T (resident)
                pl.BlockSpec((1, in_dim), lambda i: (0, 0)),        # b2
            ],
            out_specs=[
                pl.BlockSpec((tb, out_dim), lambda i: (i, 0)),      # encoded
                pl.BlockSpec((tb, in_dim), lambda i: (i, 0)),       # decoded
            ],
        ),
        compiler_params=pltpu.CompilerParams(
            dimension_semantics=("parallel",),
            vmem_limit_bytes=vmem_limit),
        cost_estimate=cost,
    )(x, w1t, b1r, w2t, b2r)

    if b_pad != B:
        encoded = encoded[:B]
        decoded = decoded[:B]
    return encoded, decoded


if __name__ == "__main__":
    IN, OUT = 256, 128

    key = jax.random.PRNGKey(0)
    kx, kw1, kb1, kw2, kb2, kx2 = jax.random.split(key, 6)

    # Deterministic parameter init (nn.Linear-style uniform bounds).
    bound1 = 1.0 / (IN ** 0.5)
    w1 = jax.random.uniform(kw1, (OUT, IN), minval=-bound1, maxval=bound1,
                            dtype=jnp.float32)
    b1 = jax.random.uniform(kb1, (OUT,), minval=-bound1, maxval=bound1,
                            dtype=jnp.float32)
    bound2 = 1.0 / (OUT ** 0.5)
    w2 = jax.random.uniform(kw2, (IN, OUT), minval=-bound2, maxval=bound2,
                            dtype=jnp.float32)
    b2 = jax.random.uniform(kb2, (IN,), minval=-bound2, maxval=bound2,
                            dtype=jnp.float32)

    def ref(xv):
        enc = jnp.maximum(xv @ w1.T + b1, 0.0)
        dec = jax.nn.sigmoid(enc @ w2.T + b2)
        return enc, dec

    # Case 1: batch not a multiple of the tile (exercises cdiv + padding path).
    B1 = 40
    x1 = jax.random.normal(kx, (B1, IN), dtype=jnp.float32)
    enc1, dec1 = autoencoder_forward(x1, w1, b1, w2, b2)
    jax.block_until_ready((enc1, dec1))
    enc1_r, dec1_r = ref(x1)
    assert enc1.shape == (B1, OUT) and dec1.shape == (B1, IN)
    assert jnp.allclose(enc1, enc1_r, atol=1e-5)
    assert jnp.allclose(dec1, dec1_r, atol=1e-5)

    # Case 2: larger batch exercising the full 256-row tile with a 2-step grid.
    B2 = 512
    x2 = jax.random.normal(kx2, (B2, IN), dtype=jnp.float32)
    enc2, dec2 = autoencoder_forward(x2, w1, b1, w2, b2)
    jax.block_until_ready((enc2, dec2))
    enc2_r, dec2_r = ref(x2)
    assert enc2.shape == (B2, OUT) and dec2.shape == (B2, IN)
    assert jnp.allclose(enc2, enc2_r, atol=1e-5)
    assert jnp.allclose(dec2, dec2_r, atol=1e-5)

    print("KERNEL_OK")
</pallas_src>

<mosaic_0001>
module attributes {stable_mosaic.version = 11 : i64} {
  func.func @autoencoder_kernel(%arg0: i32, %arg1: memref<24x256xf32, #tpu.memory_space<vmem>>, %arg2: memref<256x128xf32, #tpu.memory_space<vmem>>, %arg3: memref<1x128xf32, #tpu.memory_space<vmem>>, %arg4: memref<128x256xf32, #tpu.memory_space<vmem>>, %arg5: memref<1x256xf32, #tpu.memory_space<vmem>>, %arg6: memref<24x128xf32, #tpu.memory_space<vmem>>, %arg7: memref<24x256xf32, #tpu.memory_space<vmem>>) attributes {dimension_semantics = [#tpu.dimension_semantics<parallel>], iteration_bounds = array<i64: 2>, scalar_prefetch = 0 : i64, scratch_operands = 0 : i64, tpu.core_type = #tpu.core_type<tc>, window_params = [{transform_indices = @transform_0, window_bounds = array<i64: 24, 256>}, {pipeline_mode = #tpu.pipeline_mode<synchronous>, transform_indices = @transform_1, window_bounds = array<i64: 256, 128>}, {pipeline_mode = #tpu.pipeline_mode<synchronous>, transform_indices = @transform_2, window_bounds = array<i64: 1, 128>}, {pipeline_mode = #tpu.pipeline_mode<synchronous>, transform_indices = @transform_3, window_bounds = array<i64: 128, 256>}, {pipeline_mode = #tpu.pipeline_mode<synchronous>, transform_indices = @transform_4, window_bounds = array<i64: 1, 256>}, {transform_indices = @transform_5, window_bounds = array<i64: 24, 128>}, {transform_indices = @transform_6, window_bounds = array<i64: 24, 256>}]} {
    %c0 = arith.constant 0 : index
    %c0_0 = arith.constant 0 : index
    %0 = vector.load %arg1[%c0, %c0_0] : memref<24x256xf32, #tpu.memory_space<vmem>>, vector<24x256xf32>
    %c0_1 = arith.constant 0 : index
    %c0_2 = arith.constant 0 : index
    %1 = vector.load %arg2[%c0_1, %c0_2] : memref<256x128xf32, #tpu.memory_space<vmem>>, vector<256x128xf32>
    %cst = arith.constant dense<0.000000e+00> : vector<24x128xf32>
    %2 = tpu.matmul %0, %1, %cst {dimension_numbers = #tpu.dot_dimension_numbers<[1], [0], [0], [1], [0, 0, 1, 1], [], []>} : vector<24x256xf32>, vector<256x128xf32>, vector<24x128xf32> -> vector<24x128xf32>
    %c0_3 = arith.constant 0 : index
    %c0_4 = arith.constant 0 : index
    %3 = vector.load %arg3[%c0_3, %c0_4] : memref<1x128xf32, #tpu.memory_space<vmem>>, vector<1x128xf32>
    %4 = vector.broadcast %3 : vector<1x128xf32> to vector<24x128xf32>
    %5 = arith.addf %2, %4 : vector<24x128xf32>
    %cst_5 = arith.constant 0.000000e+00 : f32
    %6 = vector.broadcast %cst_5 : f32 to vector<24x128xf32>
    %7 = arith.maximumf %5, %6 : vector<24x128xf32>
    %c0_6 = arith.constant 0 : index
    %c0_7 = arith.constant 0 : index
    %8 = vector.load %arg6[%c0_6, %c0_7] : memref<24x128xf32, #tpu.memory_space<vmem>>, vector<24x128xf32>
    tpu.vector_store %arg6[%c0_6, %c0_7], %7 {strides = array<i32>} : memref<24x128xf32, #tpu.memory_space<vmem>>, vector<24x128xf32>,
    %c0_8 = arith.constant 0 : index
    %c0_9 = arith.constant 0 : index
    %9 = vector.load %arg4[%c0_8, %c0_9] : memref<128x256xf32, #tpu.memory_space<vmem>>, vector<128x256xf32>
    %cst_10 = arith.constant dense<0.000000e+00> : vector<24x256xf32>
    %10 = tpu.matmul %7, %9, %cst_10 {dimension_numbers = #tpu.dot_dimension_numbers<[1], [0], [0], [1], [0, 0, 1, 1], [], []>} : vector<24x128xf32>, vector<128x256xf32>, vector<24x256xf32> -> vector<24x256xf32>
    %c0_11 = arith.constant 0 : index
    %c0_12 = arith.constant 0 : index
    %11 = vector.load %arg5[%c0_11, %c0_12] : memref<1x256xf32, #tpu.memory_space<vmem>>, vector<1x256xf32>
    %12 = vector.broadcast %11 : vector<1x256xf32> to vector<24x256xf32>
    %13 = arith.addf %10, %12 : vector<24x256xf32>
    %14 = arith.negf %13 : vector<24x256xf32>
    %15 = math.exp %14 : vector<24x256xf32>
    %cst_13 = arith.constant 1.000000e+00 : f32
    %16 = vector.broadcast %cst_13 : f32 to vector<24x256xf32>
    %17 = arith.addf %16, %15 : vector<24x256xf32>
    %18 = arith.divf %16, %17 : vector<24x256xf32>
    %c0_14 = arith.constant 0 : index
    %c0_15 = arith.constant 0 : index
    %19 = vector.load %arg7[%c0_14, %c0_15] : memref<24x256xf32, #tpu.memory_space<vmem>>, vector<24x256xf32>
    tpu.vector_store %arg7[%c0_14, %c0_15], %18 {strides = array<i32>} : memref<24x256xf32, #tpu.memory_space<vmem>>, vector<24x256xf32>,
    return
  }
  func.func @transform_0(%arg0: i32) -> (i32, i32) {
    %c0_i32 = arith.constant 0 : i32
    %c0_i32_0 = arith.constant 0 : i32
    return %arg0, %c0_i32 : i32, i32
  }
  func.func @transform_1(%arg0: i32) -> (i32, i32) {
    %c0_i32 = arith.constant 0 : i32
    %c0_i32_0 = arith.constant 0 : i32
    %c0_i32_1 = arith.constant 0 : i32
    return %c0_i32, %c0_i32_0 : i32, i32
  }
  func.func @transform_2(%arg0: i32) -> (i32, i32) {
    %c0_i32 = arith.constant 0 : i32
    %c0_i32_0 = arith.constant 0 : i32
    %c0_i32_1 = arith.constant 0 : i32
    return %c0_i32, %c0_i32_0 : i32, i32
  }
  func.func @transform_3(%arg0: i32) -> (i32, i32) {
    %c0_i32 = arith.constant 0 : i32
    %c0_i32_0 = arith.constant 0 : i32
    %c0_i32_1 = arith.constant 0 : i32
    return %c0_i32, %c0_i32_0 : i32, i32
  }
  func.func @transform_4(%arg0: i32) -> (i32, i32) {
    %c0_i32 = arith.constant 0 : i32
    %c0_i32_0 = arith.constant 0 : i32
    %c0_i32_1 = arith.constant 0 : i32
    return %c0_i32, %c0_i32_0 : i32, i32
  }
  func.func @transform_5(%arg0: i32) -> (i32, i32) {
    %c0_i32 = arith.constant 0 : i32
    %c0_i32_0 = arith.constant 0 : i32
    return %arg0, %c0_i32 : i32, i32
  }
  func.func @transform_6(%arg0: i32) -> (i32, i32) {
    %c0_i32 = arith.constant 0 : i32
    %c0_i32_0 = arith.constant 0 : i32
    return %arg0, %c0_i32 : i32, i32
  }
}

</mosaic_0001>

<bundles_post_ra>
// kernel: tpu_custom_call.1
= control target key start
LH: loop header
LB: loop body
LE: loop exit
PB: predicated region body
PF: predicated region fallthrough
CT: control target
= control target key end

     0   :  { %12 = vsyncpa [#allocation3], 0  ;;  %s1425_s0 = inlined_call_operand.hbm [shape: f32[48,256], index: 0, kind: input, shape index: {}]   ;;  %s1426_s1 = inlined_call_operand.hbm [shape: f32[256,128], index: 1, kind: input, shape index: {}]   ;;  %s1427_s2 = inlined_call_operand.vmem [shape: f32[1,128], index: 2, kind: input, shape index: {}]   ;;  %s1428_s3 = inlined_call_operand.hbm [shape: f32[128,256], index: 3, kind: input, shape index: {}]   ;;  %s1429_s4 = inlined_call_operand.vmem [shape: f32[1,256], index: 4, kind: input, shape index: {}]   ;;  %s1430_s5 = inlined_call_operand.hbm [shape: f32[48,128], index: 5, kind: output, shape index: {0}]   ;;  %s1431_s6 = inlined_call_operand.hbm [shape: f32[48,256], index: 6, kind: output, shape index: {1}]  }
   0x1   :  { %14 = vsyncpa [#allocation3 + $0x1], 0 }
   0x2   :  { %15 = vsyncpa [#allocation6], 0 }
   0x3   :  { %16 = vsyncpa [#allocation4], 0 }
   0x4   :  { %18 = vsyncpa [#allocation4 + $0x1], 0 }
   0x5   :  { %19 = vsyncpa [#allocation10], 0 }
   0x6   :  { %21 = vsyncpa [#allocation10 + $0x1], 0  ;;  %s1181_s21 = smov 0   ;;  %s1183_s22 = smov 0  }
   0x7   :  { %s1185_s23 = smov 0   ;;  %s1187_s24 = smov 0  }
   0x8 LB: > { %s1202_s25 = sadd.s32 4294967295, %s1130_s24   ;;  %s774_s26 = sadd.s32 4294967294, %s1130_s24   ;;  %s1130_s24 = sphi %s1187_s24, %s1457_s24   ;;  %s1126_s23 = sphi %s1185_s23, %s1456_s23   ;;  %s1122_s22 = sphi %s1183_s22, %s1455_s22   ;;  %s1118_s21 = sphi %s1181_s21, %s1454_s21  }
   0x9   : > { %p47_p0 = scmp.ne.s32.totalorder %s1122_s22, %s1118_s21  ;;  %p1432_p1 = scmp.eq.s32.totalorder %s1202_s25, 0 }
   0xa   : > { %p161_p3 = scmp.eq.s32.totalorder %s774_s26, 1  ;;  %p775_p5 = scmp.ge.s32.totalorder %s1130_s24, 1 }
   0xb   : > { %p1211_p4 = por %p1432_p1, %p47_p0  ;;  %p194_p7 = scmp.lt.s32.totalorder %s1130_s24, 3 }
   0xc   : > { %p1216_p6 = por %p161_p3, %p47_p0  ;;  %s1132_s30 = smov [#allocation5]  }
   0xd   : > { %s1438_s27 = scalar_select %p1211_p4, 1, 0 }
   0xe   : > { %s1439_s28 = scalar_select %p1216_p6, 1, 0 }
   0xf   : > { %p1221_p8 = pnand %p775_p5, %p194_p7  ;;  %s206_s7 = sshll.u32 %s1132_s30, 4  ;;  %s207_s7 = int_to_ptr.vmem [resolvable:$true] %s206_s7 }
  0x10   : > { %s1133_s9 = smov [#allocation7]   ;;  %s963_s11 = scalar_lea.vmem %s207_s7, 4096 }
  0x11   : > { %s1440_s29 = scalar_select %p1221_p8, 1, 0 }
  0x12   : > { %p861_p9 = pneg %p1221_p8  ;;  %s222_s10 = sshll.u32 %s1133_s9, 4  ;;  %s223_s10 = int_to_ptr.vmem [resolvable:$true] %s222_s10 }
  0x13   : > { %p964_p13 = scmp.ne.s32.totalorder %s207_s7, %s963_s11  ;;  %p971_p5 = scmp.lt.s32.totalorder %s207_s7, %s207_s7 }
  0x14   : > { %p1230_p11 = pnand %p861_p9, %p1432_p1  ;;  %p972_p7 = scmp.lt.s32.totalorder %s963_s11, %s963_s11 }
  0x16   : > { %p954_p12 = pneg %p1230_p11  ;;  %p973_p10 = por %p972_p7, %p971_p5 }
  0x18   : > { %p966_p0 = pnand %p964_p13, %p954_p12 }
  0x1a   : > { %p967_p3 = pneg %p966_p0 }
  0x1c   : > { %p974_p9 = pnand %p973_p10, %p967_p3 }
  0x1e   : > { %977 = shalt.err (!%p974_p9)
}
  0x1f   : > { %s1134_s12 = smov 128   ;;  %s1135_s13 = smov 8  }
  0x20   : > { %864 = dma.hbm_to_vmem [thread:$0]  (!%p1230_p11), %s1426_s1, 4096, %s207_s7, [#allocation6], %s1134_s12, %s1134_s12, %s1135_s13  }
  0x21   : > { %s989_s16 = scalar_lea.vmem %s223_s10, 4096  ;;  %p997_p2 = scmp.lt.s32.totalorder %s223_s10, %s223_s10 }
  0x22   : > { %p990_p1 = scmp.ne.s32.totalorder %s223_s10, %s989_s16  ;;  %p998_p6 = scmp.lt.s32.totalorder %s989_s16, %s989_s16 }
  0x24   : > { %p992_p13 = pnand %p990_p1, %p954_p12  ;;  %p999_p5 = por %p998_p6, %p997_p2 }
  0x26   : > { %p993_p0 = pneg %p992_p13 }
  0x28   : > { %p1000_p10 = pnand %p999_p5, %p993_p0 }
  0x2a   : > { %1003 = shalt.err (!%p1000_p10)
}
  0x2b   : > { %s1433_s17 = smov 256   ;;  %s1434_s18 = smov 16  }
  0x2c   : > { %867 = dma.hbm_to_vmem [thread:$0]  (!%p1230_p11), %s1428_s3, 4096, %s223_s10, [#allocation6], %s1433_s17, %s1433_s17, %s1434_s18  }
  0x2d   : > { %s1256_s26 = sadd.s32 1, %s1130_s24   ;;  %s34_s7 = sadd.s32 1, %s1126_s23 }
  0x2e   : > { %s31_s30 = ssub.s32 %s1130_s24, %s1256_s26  ;;  %p41_p2 = scmp.ne.s32.totalorder %s1126_s23, %s1122_s22 }
  0x2f   : > { %p32_p1 = scmp.eq.s32.totalorder %s31_s30, 0  ;;  %p42_p6 = scmp.eq.s32.totalorder %s1130_s24, 0 }
  0x30   : > { %p1442_p3 = scmp.eq.s32.totalorder %s1202_s25, 1  ;;  %p881_p9 = scmp.lt.s32.totalorder %s1130_s24, 2 }
  0x31   : > { %s1265_s9 = scalar_select %p32_p1, %s1126_s23, %s34_s7  }
  0x32   : > { %p43_p12 = por %p42_p6, %p41_p2  ;;  %p1269_p7 = por %p1442_p3, %p41_p2 }
  0x33   : > { %s239_s11 = sand.u32 1, %s1126_s23   ;;  %s801_s10 = smul.u32 768, %s1130_s24 }
  0x34   : > { %s1443_s8 = scalar_select %p1269_p7, 1, 0 }
  0x35   : > { %s844_s12 = smul.u32 48, %s239_s11  ;;  %p1276_p11 = pnand %p881_p9, %p43_p12 }
  0x36   : > { %s1283_s16 = scalar_lea.hbm %s1425_s0, %s801_s10  ;;  %s1287_s30 = scalar_lea.sflag [#allocation3], %s239_s11 }
  0x37   : > { %s243_s19 = scalar_lea.vmem [#allocation2], %s844_s12  ;;  %s1004_s7 = scalar_lea.hbm %s1283_s16, 768 }
  0x38   : > { %s251_s20 = sshll.u32 %s243_s19, 4  ;;  %p1005_p13 = scmp.ne.s32.totalorder %s1283_s16, %s1004_s7  ;;  %s1285_s20 = int_to_ptr.vmem [resolvable:$true] %s251_s20 }
  0x39   : > { %p1006_p0 = pneg %p1276_p11  ;;  %s1009_s10 = scalar_lea.hbm %s1425_s0, 1536 }
  0x3a   : > { %p1010_p1 = scmp.lt.s32.totalorder %s1283_s16, %s1425_s0  ;;  %p1011_p2 = scmp.lt.s32.totalorder %s1009_s10, %s1004_s7 }
  0x3b   : > { %p1007_p5 = pnand %p1006_p0, %p1005_p13 }
  0x3c   : > { %p1012_p6 = por %p1011_p2, %p1010_p1 }
  0x3d   : > { %p1008_p10 = pneg %p1007_p5 }
  0x3f   : > { %p1013_p12 = pnand %p1012_p6, %p1008_p10 }
  0x41   : > { %1016 = shalt.err (!%p1013_p12)
}
  0x42   : > { %s1017_s11 = scalar_lea.vmem %s1285_s20, 768  ;;  %s1138_s12 = smov [#allocation2]  }
  0x43   : > { %p1018_p3 = scmp.ne.s32.totalorder %s1285_s20, %s1017_s11  ;;  %s1022_s19 = sshll.u32 %s1138_s12, 4  ;;  %s1023_s19 = int_to_ptr.vmem [resolvable:$false] %s1022_s19 }
  0x44   : > { %s1024_s17 = scalar_lea.vmem %s1023_s19, 1536  ;;  %p1025_p5 = scmp.lt.s32.totalorder %s1285_s20, %s1023_s19 }
  0x45   : > { %p1020_p9 = pnand %p1018_p3, %p1006_p0  ;;  %p1026_p7 = scmp.lt.s32.totalorder %s1024_s17, %s1017_s11 }
  0x47   : > { %p1021_p13 = pneg %p1020_p9  ;;  %p1027_p4 = por %p1026_p7, %p1025_p5 }
  0x49   : > { %p1028_p8 = pnand %p1027_p4, %p1021_p13 }
  0x4b   : > { %1031 = shalt.err (!%p1028_p8)
}
  0x4c   : > { %s1445_s18 = smov 16   ;;  %s1446_s7 = smov 256  }
  0x4d   : > { %871 = dma.hbm_to_vmem [thread:$0]  (!%p1276_p11), %s1283_s16, 768, %s1285_s20, %s1287_s30, %s1446_s7, %s1446_s7, %s1445_s18  }
  0x4e   : > { %p1447_p0 = scmp.ne.s32.totalorder %s1440_s29, 0 }
  0x4f   : > { %s1314_s14 = sand.u32 (!%p1447_p0), 1, %s1122_s22   ;;  %p1448_p4 = scmp.ne.s32.totalorder (!%p1447_p0), %s1438_s27, 0 }
  0x50   : > { %263 = sbr.rel (%p1447_p0) target bundleno = 574 (0x23e), region = 40  ;;  %s266_s15 = scalar_lea.sflag (!%p1447_p0), [#allocation3], %s1314_s14 }
  0x51   : > { %s845_s10 = smul.u32 (!%p1447_p0), 48, %s1314_s14 }
  0x53   : > { %s1320_s13 = scalar_lea.vmem (!%p1447_p0), [#allocation2], %s845_s10 }
  0x55   : > { %1101 = dma.done.wait (%p1448_p4), %s266_s15, 768  }
  0x56   : > { %1103 = vsyncadd (%p1448_p4), %s266_s15, 4294966528  ;;  %p1449_p8 = scmp.eq.s32.totalorder %s1202_s25, 0 }
  0x58   : > { %1105 = dma.done.wait (%p1449_p8), [#allocation6], 8192   ;;  %p1450_p7 = pmov %p1449_p8 }
  0x59   : > { %v351_v0 = vld [vmem:[#allocation5 + $0xf8] sm:$0xff]  ;;  %v350_v2 = vld [vmem:[#allocation5 + $0xf0] sm:$0xff]  ;;  %v349_v4 = vld [vmem:[#allocation5 + $0xe8] sm:$0xff]  ;;  %s846_s27 = smul.u32 24, %s1314_s14  ;;  %s615_s18 = scalar_lea.sflag [#allocation4], %s1314_s14 }
  0x5a   : > { %1107 = vsyncadd (%p1450_p7), [#allocation6], 4294959104  ;;  %v335_v1 = vld [vmem:[#allocation5 + $0x78] sm:$0xff]  ;;  %803 = vmatprep.subr.mxu0 %v351_v0  ;;  %v334_v3 = vld [vmem:[#allocation5 + $0x70] sm:$0xff]  ;;  %s798_s11 = smul.u32 384, %s1202_s25  ;;  %p1451_p10 = scmp.ne.s32.totalorder %s1443_s8, 0 }
  0x5b   : > { %804 = vmatpush3.msra.mxu0 %v335_v1  ;;  %v333_v5 = vld [vmem:[#allocation5 + $0x68] sm:$0xff]  ;;  %v348_v6 = vld [vmem:[#allocation5 + $0xe0] sm:$0xff]  ;;  %v347_v8 = vld [vmem:[#allocation5 + $0xd8] sm:$0xff]  ;;  %s303_s20 = scalar_lea.vmem [#allocation8], %s846_s27  ;;  %s1140_s15 = smov [#allocation8]  }
  0x5c   : > { %805 = vmatprep.subr.mxu0 %v350_v2  ;;  %v332_v7 = vld [vmem:[#allocation5 + $0x60] sm:$0xff]  ;;  %v331_v9 = vld [vmem:[#allocation5 + $0x58] sm:$0xff]  ;;  %v346_v10 = vld [vmem:[#allocation5 + $0xd0] sm:$0xff]  ;;  %s633_s30 = sshll.u32 %s303_s20, 4  ;;  %s1346_s17 = scalar_lea.hbm %s1430_s5, %s798_s11  ;;  %s1340_s30 = int_to_ptr.vmem [resolvable:$true] %s633_s30 }
  0x5d   : > { %806 = vmatpush3.msra.mxu0 %v334_v3  ;;  %v330_v11 = vld [vmem:[#allocation5 + $0x50] sm:$0xff]  ;;  %v345_v12 = vld [vmem:[#allocation5 + $0xc8] sm:$0xff]  ;;  %v344_v15 = vld [vmem:[#allocation5 + $0xc0] sm:$0xff]  ;;  %s1032_s7 = scalar_lea.vmem %s1340_s30, 384 }
  0x5e   : > { %807 = vmatprep.subr.mxu0 %v349_v4  ;;  %v315_v13 = vld [vmem:[%s1320_s13 + $0x8] sm:$0xff]  ;;  %v328_v16 = vld [vmem:[#allocation5 + $0x40] sm:$0xff]  ;;  %v475_v18 = vld [vmem:[#allocation7 + $0xf0] sm:$0xff]  ;;  %p1033_p11 = scmp.ne.s32.totalorder %s1340_s30, %s1032_s7 }
  0x5f   : > { %808 = vmatpush3.msra.mxu0 %v333_v5  ;;  %v329_v14 = vld [vmem:[#allocation5 + $0x48] sm:$0xff]  ;;  %423 = vmatprep.mubr.f32.mxu0 %v315_v13  ;;  %v476_v17 = vld [vmem:[#allocation7 + $0xf8] sm:$0xff]  ;;  %v473_v20 = vld [vmem:[#allocation7 + $0xe0] sm:$0xff] }
  0x60   : > { %809 = vmatprep.subr.mxu0 %v348_v6  ;;  %489 = vmatprep.subr.mxu1 %v476_v17  ;;  %v474_v19 = vld [vmem:[#allocation7 + $0xe8] sm:$0xff]  ;;  %v343_v21 = vld [vmem:[#allocation5 + $0xb8] sm:$0xff]  ;;  %v471_v24 = vld [vmem:[#allocation7 + $0xd0] sm:$0xff]  ;;  %v1139_v6 = vmov 0.0   ;;  %p1034_p1 = pnand %p1033_p11, %p1451_p10 }
  0x61   : > { %810 = vmatpush3.msra.mxu0 %v332_v7  ;;  %490 = vmatpush1.msra.mxu1 %v475_v18  ;;  %v472_v22 = vld [vmem:[#allocation7 + $0xd8] sm:$0xff]  ;;  %v342_v25 = vld [vmem:[#allocation5 + $0xb0] sm:$0xff]  ;;  %v470_v26 = vld [vmem:[#allocation7 + $0xc8] sm:$0xff] }
  0x62   : > { %811 = vmatprep.subr.mxu0 %v347_v8  ;;  %v327_v23 = vld [vmem:[#allocation5 + $0x38] sm:$0xff]  ;;  %491 = vmatprep.subr.mxu1 %v474_v19  ;;  %v326_v27 = vld [vmem:[#allocation5 + $0x30] sm:$0xff]  ;;  %v469_v28 = vld [vmem:[#allocation7 + $0xc0] sm:$0xff]  ;;  %p1035_p2 = pneg %p1034_p1 }
  0x63   : > { %812 = vmatpush3.msra.mxu0 %v331_v9  ;;  %492 = vmatpush1.msra.mxu1 %v473_v20  ;;  %v341_v29 = vld [vmem:[#allocation5 + $0xa8] sm:$0xff]  ;;  %v468_v30 = vld [vmem:[#allocation7 + $0xb8] sm:$0xff]  ;;  %v467_v32 = vld [vmem:[#allocation7 + $0xb0] sm:$0xff] }
  0x64   : > { %813 = vmatprep.subr.mxu0 %v346_v10  ;;  %493 = vmatprep.subr.mxu1 %v472_v22  ;;  %v325_v31 = vld [vmem:[#allocation5 + $0x28] sm:$0xff]  ;;  %v340_v33 = vld [vmem:[#allocation5 + $0xa0] sm:$0xff]  ;;  %v339_v37 = vld [vmem:[#allocation5 + $0x98] sm:$0xff] }
  0x65   : > { %814 = vmatpush3.msra.mxu0 %v330_v11  ;;  %494 = vmatpush1.msra.mxu1 %v471_v24  ;;  %v466_v34 = vld [vmem:[#allocation7 + $0xa8] sm:$0xff]  ;;  %v324_v35 = vld [vmem:[#allocation5 + $0x20] sm:$0xff]  ;;  %v464_v38 = vld [vmem:[#allocation7 + $0x98] sm:$0xff] }
  0x66   : > { %815 = vmatprep.subr.mxu0 %v345_v12  ;;  %495 = vmatprep.subr.mxu1 %v470_v26  ;;  %v465_v36 = vld [vmem:[#allocation7 + $0xa0] sm:$0xff]  ;;  %v323_v39 = vld [vmem:[#allocation5 + $0x18] sm:$0xff]  ;;  %v463_v40 = vld [vmem:[#allocation7 + $0x90] sm:$0xff] }
  0x67   : > { %816 = vmatpush3.msra.mxu0 %v329_v14  ;;  %496 = vmatpush1.msra.mxu1 %v469_v28  ;;  %v338_v41 = vld [vmem:[#allocation5 + $0x90] sm:$0xff]  ;;  %v462_v42 = vld [vmem:[#allocation7 + $0x88] sm:$0xff]  ;;  %v461_v44 = vld [vmem:[#allocation7 + $0x80] sm:$0xff] }
  0x68   : > { %817 = vmatprep.subr.mxu0 %v344_v15  ;;  %497 = vmatprep.subr.mxu1 %v468_v30  ;;  %v322_v43 = vld [vmem:[#allocation5 + $0x10] sm:$0xff]  ;;  %v337_v45 = vld [vmem:[#allocation5 + $0x88] sm:$0xff]  ;;  %v460_v46 = vld [vmem:[#allocation7 + $0x78] sm:$0xff] }
  0x69   : > { %818 = vmatpush3.msra.mxu0 %v328_v16  ;;  %498 = vmatpush1.msra.mxu1 %v467_v32  ;;  %v321_v47 = vld [vmem:[#allocation5 + $0x8] sm:$0xff]  ;;  %v459_v48 = vld [vmem:[#allocation7 + $0x70] sm:$0xff]  ;;  %v336_v49 = vld [vmem:[#allocation5 + $0x80] sm:$0xff] }
  0x6a   : > { %819 = vmatprep.subr.mxu0 %v343_v21  ;;  %499 = vmatprep.subr.mxu1 %v466_v34  ;;  %v458_v50 = vld [vmem:[#allocation7 + $0x68] sm:$0xff]  ;;  %v320_v51 = vld [vmem:[#allocation5] sm:$0xff]  ;;  %v456_v54 = vld [vmem:[#allocation7 + $0x58] sm:$0xff] }
  0x6b   : > { %820 = vmatpush3.msra.mxu0 %v327_v23  ;;  %500 = vmatpush1.msra.mxu1 %v465_v36  ;;  %v457_v52 = vld [vmem:[#allocation7 + $0x60] sm:$0xff]  ;;  %v317_v55 = vld [vmem:[%s1320_s13 + $0x18] sm:$0xff]  ;;  %v455_v56 = vld [vmem:[#allocation7 + $0x50] sm:$0xff] }
  0x6c   : > { %821 = vmatprep.subr.mxu0 %v342_v25  ;;  %501 = vmatprep.subr.mxu1 %v464_v38  ;;  %v314_v53 = vld [vmem:[%s1320_s13] sm:$0xff]  ;;  %v454_v57 = vld [vmem:[#allocation7 + $0x48] sm:$0xff]  ;;  %v316_v58 = vld [vmem:[%s1320_s13 + $0x10] sm:$0xff] }
  0x6d   : > { %822 = vmatpush3.msra.mxu0 %v326_v27  ;;  %502 = vmatpush1.msra.mxu1 %v463_v40  ;;  %v319_v59 = vld [vmem:[%s1320_s13 + $0x28] sm:$0xff]  ;;  %v318_v60 = vld [vmem:[%s1320_s13 + $0x20] sm:$0xff]  ;;  %s1036_s13 = sshll.u32 %s1140_s15, 4  ;;  %s1037_s13 = int_to_ptr.vmem [resolvable:$false] %s1036_s13 }
  0x6e   : > { %823 = vmatprep.subr.mxu0 %v341_v29  ;;  %503 = vmatprep.subr.mxu1 %v462_v42  ;;  %v453_v61 = vld [vmem:[#allocation7 + $0x40] sm:$0xff]  ;;  %v452_v62 = vld [vmem:[#allocation7 + $0x38] sm:$0xff]  ;;  %v451_v63 = vld [vmem:[#allocation7 + $0x30] sm:$0xff]  ;;  %s1038_s27 = scalar_lea.vmem %s1037_s13, 768  ;;  %p1039_p6 = scmp.lt.s32.totalorder %s1340_s30, %s1037_s13 }
  0x6f   : > { %824 = vmatpush3.msra.mxu0 %v325_v31  ;;  %504 = vmatpush1.msra.mxu1 %v461_v44  ;;  %v450_v0 = vld [vmem:[#allocation7 + $0x28] sm:$0xff]  ;;  %v449_v1 = vld [vmem:[#allocation7 + $0x20] sm:$0xff]  ;;  %v448_v2 = vld [vmem:[#allocation7 + $0x18] sm:$0xff]  ;;  %p1040_p12 = scmp.lt.s32.totalorder %s1038_s27, %s1032_s7 }
  0x70   : > { %825 = vmatprep.subr.mxu0 %v340_v33  ;;  %505 = vmatprep.subr.mxu1 %v460_v46  ;;  %v447_v3 = vld [vmem:[#allocation7 + $0x10] sm:$0xff]  ;;  %v446_v4 = vld [vmem:[#allocation7 + $0x8] sm:$0xff]  ;;  %v445_v5 = vld [vmem:[#allocation7] sm:$0xff] }
  0x71   : > { %826 = vmatpush3.msra.mxu0 %v324_v35  ;;  %506 = vmatpush1.msra.mxu1 %v459_v48  ;;  %v784_v8 = vld [vmem:[%s1427_s2] ss:$0 sm:$0xff]  ;;  %p1041_p3 = por %p1040_p12, %p1039_p6 }
  0x72   : > { %827 = vmatprep.subr.mxu0 %v339_v37  ;;  %507 = vmatprep.subr.mxu1 %v458_v50 }
  0x73   : > { %828 = vmatpush3.msra.mxu0 %v323_v39  ;;  %508 = vmatpush1.msra.mxu1 %v457_v52  ;;  %p1042_p9 = pnand %p1041_p3, %p1035_p2 }
  0x74   : > { %829 = vmatprep.subr.mxu0 %v338_v41  ;;  %509 = vmatprep.subr.mxu1 %v456_v54 }
  0x75   : > { %830 = vmatpush3.msra.mxu0 %v322_v43  ;;  %510 = vmatpush1.msra.mxu1 %v455_v56 }
  0x76   : > { %831 = vmatprep.subr.mxu0 %v337_v45  ;;  %511 = vmatprep.subr.mxu1 %v454_v57 }
  0x77   : > { %832 = vmatpush3.msra.mxu0 %v321_v47  ;;  %512 = vmatpush1.msra.mxu1 %v453_v61 }
  0x78   : > { %833 = vmatprep.subr.mxu0 %v336_v49  ;;  %513 = vmatprep.subr.mxu1 %v452_v62 }
  0x79   : > { %834 = vmatpush3.msra.mxu0 %v320_v51  ;;  %514 = vmatpush1.msra.mxu1 %v451_v63 }
  0x7a   : > { %424 = vmatmul.mubr.f32.vlgmr.msra.gmra.mxu0 %v314_v53  ;;  %515 = vmatprep.subr.mxu1 %v450_v0 }
  0x7b   : > { %428 = vmatprep.mubr.f32.mxu0 %v317_v55  ;;  %516 = vmatpush1.msra.mxu1 %v449_v1 }
  0x7c   : > { %517 = vmatprep.subr.mxu1 %v448_v2  ;;  %553 = vmatprep.mubr.f32.mxu1 %v1139_v6 }
  0x7d   : > { %518 = vmatpush1.msra.mxu1 %v447_v3 }
  0x7e   : > { %429 = vmatmul.mubr.f32.gmra.mxu0 %v316_v58  ;;  %519 = vmatprep.subr.mxu1 %v446_v4 }
  0x7f   : > { %433 = vmatprep.mubr.f32.mxu0 %v319_v59  ;;  %520 = vmatpush1.msra.mxu1 %v445_v5 }
  0x82   : > { %434 = vmatmul.mubr.f32.gmra.mxu0 %v318_v60 }
 0x13a   : > { %v835_v7 = vpop.f32.mrf.mxu0 }
 0x13c   : > { %v836_v9 = vpop.f32.mrf.mxu0 }
 0x13d   : > { %v837_v10 = vadd.f32 %v836_v9, %v835_v7 }
 0x13e   : > { %v838_v11 = vpop.f32.mrf.mxu0 }
 0x13f   : > { %v426_v12 = vadd.f32 %v837_v10, %v784_v8 }
 0x140   : > { %v839_v13 = vpop.f32.mrf.mxu0 }
 0x141   : > { %v439_v14 = vmax.f32 %v426_v12, 0.0  ;;  %v840_v15 = vadd.f32 %v839_v13, %v838_v11 }
 0x142   : > { %v841_v16 = vpop.f32.mrf.mxu0 }
 0x143   : > { %442 = vst [vmem:[%s303_s20] sm:$0xff] %v439_v14  ;;  %v431_v17 = vadd.f32 %v840_v15, %v784_v8  ;;  %554 = vmatmul.mubr.f32.vlgmr.msra.gmra.mxu1 %v439_v14 }
 0x144   : > { %v842_v18 = vpop.f32.mrf.mxu0  ;;  %559 = vmatprep.mubr.f32.mxu1 %v1139_v6 }
 0x145   : > { %v440_v19 = vmax.f32 %v431_v17, 0.0  ;;  %v843_v20 = vadd.f32 %v842_v18, %v841_v16 }
 0x147   : > { %443 = vst [vmem:[%s303_s20 + $0x8] sm:$0xff] %v440_v19  ;;  %v436_v21 = vadd.f32 %v843_v20, %v784_v8  ;;  %560 = vmatmul.mubr.f32.gmra.mxu1 %v440_v19 }
 0x148   : > { %565 = vmatprep.mubr.f32.mxu1 %v1139_v6 }
 0x149   : > { %v441_v22 = vmax.f32 %v436_v21, 0.0 }
 0x14b   : > { %444 = vst [vmem:[%s303_s20 + $0x10] sm:$0xff] %v441_v22  ;;  %566 = vmatmul.mubr.f32.gmra.mxu1 %v441_v22 }
 0x14c   : > { %1045 = shalt.err (!%p1042_p9)
}
 0x14d   : > { %s1046_s29 = scalar_lea.hbm %s1346_s17, 384  ;;  %s1050_s11 = scalar_lea.hbm %s1430_s5, 768 }
 0x14e   : > { %p1047_p13 = scmp.ne.s32.totalorder %s1346_s17, %s1046_s29  ;;  %p1051_p4 = scmp.lt.s32.totalorder %s1346_s17, %s1430_s5 }
 0x14f   : > { %p1052_p8 = scmp.lt.s32.totalorder %s1050_s11, %s1046_s29 }
 0x150   : > { %p1048_p5 = pnand %p1047_p13, %p1451_p10 }
 0x151   : > { %p1053_p7 = por %p1052_p8, %p1051_p4 }
 0x152   : > { %p1049_p0 = pneg %p1048_p5 }
 0x154   : > { %p1054_p11 = pnand %p1053_p7, %p1049_p0 }
 0x156   : > { %1057 = shalt.err (!%p1054_p11)
}
 0x157   : > { %s1141_s7 = smov 128   ;;  %s1142_s15 = smov 8   ;;  %v479_v23 = vlaneseq  ;;  %v477_v26 = vld [vmem:[%s1429_s4] sm:$0x3] }
 0x158   : > { %857 = dma.vmem_to_hbm [thread:$0]  (%p1451_p10), %s1340_s30, 384, %s1346_s17, %s615_s18, %s1141_s7, %s1141_s7, %s1142_s15  }
 0x159   : > { %v480_v24 = vshrl.u32 %v479_v23, 7  ;;  %s310_s30 = scalar_lea.vmem [#allocation9], %s845_s10  ;;  %s802_s17 = smul.u32 768, %s1202_s25 }
 0x15a   : > { %s650_s18 = sshll.u32 %s310_s30, 4  ;;  %s620_s10 = scalar_lea.sflag [#allocation10], %s1314_s14  ;;  %s1382_s18 = int_to_ptr.vmem [resolvable:$true] %s650_s18 }
 0x15b   : > { %v481_v25 = vsub.s32 0, %v480_v24  ;;  %v485_v27 = vsub.s32 1, %v480_v24  ;;  %s1380_s20 = scalar_lea.hbm %s1431_s6, %s802_s17  ;;  %s1058_s25 = scalar_lea.vmem %s1382_s18, 768 }
 0x15c   : > { %p1059_p1 = scmp.ne.s32.totalorder %s1382_s18, %s1058_s25  ;;  %s1143_s11 = smov [#allocation9]  }
 0x15d   : > { %v482_v28 = vrot.slane %v477_v26, %v481_v25  ;;  %v486_v29 = vrot.slane %v477_v26, %v485_v27  ;;  %s1062_s12 = sshll.u32 %s1143_s11, 4  ;;  %s1063_s12 = int_to_ptr.vmem [resolvable:$false] %s1062_s12 }
 0x15e   : > { %p1060_p2 = pnand %p1059_p1, %p1451_p10  ;;  %s1064_s19 = scalar_lea.vmem %s1063_s12, 1536 }
 0x15f   : > { %p1065_p12 = scmp.lt.s32.totalorder %s1382_s18, %s1063_s12  ;;  %p1066_p3 = scmp.lt.s32.totalorder %s1064_s19, %s1058_s25 }
 0x160   : > { %p1061_p6 = pneg %p1060_p2 }
 0x161   : > { %p1067_p9 = por %p1066_p3, %p1065_p12 }
 0x163   : > { %p1068_p13 = pnand %p1067_p9, %p1061_p6 }
 0x203   : > { %v555_v30 = vpop.f32.mrf.mxu1 }
 0x204   : > { %v556_v31 = vadd.f32 %v555_v30, %v482_v28 }
 0x205   : > { %v557_v32 = vpop.f32.mrf.mxu1 }
 0x206   : > { %v785_v33 = vmul.f32 -1.442695, %v556_v31  ;;  %v558_v34 = vadd.f32 %v557_v32, %v486_v29 }
 0x207   : > { %v561_v35 = vpop.f32.mrf.mxu1 }
 0x208   : > { %928 = vpow2.f32 %v785_v33  ;;  %v786_v36 = vmul.f32 -1.442695, %v558_v34  ;;  %v562_v37 = vadd.f32 %v561_v35, %v482_v28 }
 0x209   : > { %v563_v38 = vpop.f32.mrf.mxu1 }
 0x20a   : > { %930 = vpow2.f32 %v786_v36  ;;  %v787_v39 = vmul.f32 -1.442695, %v562_v37  ;;  %v564_v40 = vadd.f32 %v563_v38, %v486_v29 }
 0x20b   : > { %v567_v41 = vpop.f32.mrf.mxu1 }
 0x20c   : > { %932 = vpow2.f32 %v787_v39  ;;  %v788_v42 = vmul.f32 -1.442695, %v564_v40  ;;  %v568_v43 = vadd.f32 %v567_v41, %v482_v28 }
 0x20d   : > { %v569_v44 = vpop.f32.mrf.mxu1 }
 0x20e   : > { %934 = vpow2.f32 %v788_v42  ;;  %v789_v45 = vmul.f32 -1.442695, %v568_v43  ;;  %v570_v46 = vadd.f32 %v569_v44, %v486_v29 }
 0x210   : > { %936 = vpow2.f32 %v789_v45  ;;  %v790_v47 = vmul.f32 -1.442695, %v570_v46 }
 0x212   : > { %938 = vpow2.f32 %v790_v47 }
 0x215   : > { %v929_v48 = vpop.eup %928 }
 0x216   : > { %v590_v49 = vadd.f32 1.0, %v929_v48 }
 0x217   : > { %v931_v50 = vpop.eup %930 }
 0x218   : > { %940 = vrcp.f32 %v590_v49  ;;  %v591_v51 = vadd.f32 1.0, %v931_v50 }
 0x219   : > { %v933_v52 = vpop.eup %932 }
 0x21a   : > { %942 = vrcp.f32 %v591_v51  ;;  %v592_v53 = vadd.f32 1.0, %v933_v52 }
 0x21b   : > { %v935_v54 = vpop.eup %934 }
 0x21c   : > { %944 = vrcp.f32 %v592_v53  ;;  %v593_v55 = vadd.f32 1.0, %v935_v54 }
 0x21d   : > { %v937_v56 = vpop.eup %936 }
 0x21e   : > { %946 = vrcp.f32 %v593_v55  ;;  %v594_v57 = vadd.f32 1.0, %v937_v56 }
 0x21f   : > { %v939_v58 = vpop.eup %938 }
 0x220   : > { %948 = vrcp.f32 %v594_v57  ;;  %v595_v59 = vadd.f32 1.0, %v939_v58 }
 0x222   : > { %950 = vrcp.f32 %v595_v59 }
 0x225   : > { %v941_v60 = vpop.eup %940 }
 0x226   : > { %608 = vst [vmem:[%s310_s30] sm:$0xff] %v941_v60 }
 0x227   : > { %v943_v61 = vpop.eup %942 }
 0x228   : > { %609 = vst [vmem:[%s310_s30 + $0x8] sm:$0xff] %v943_v61 }
 0x229   : > { %v945_v62 = vpop.eup %944 }
 0x22a   : > { %610 = vst [vmem:[%s310_s30 + $0x10] sm:$0xff] %v945_v62 }
 0x22b   : > { %v947_v63 = vpop.eup %946 }
 0x22c   : > { %611 = vst [vmem:[%s310_s30 + $0x18] sm:$0xff] %v947_v63 }
 0x22d   : > { %v949_v0 = vpop.eup %948 }
 0x22e   : > { %612 = vst [vmem:[%s310_s30 + $0x20] sm:$0xff] %v949_v0 }
 0x22f   : > { %v951_v1 = vpop.eup %950 }
 0x230   : > { %613 = vst [vmem:[%s310_s30 + $0x28] sm:$0xff] %v951_v1 }
 0x231   : > { %1071 = shalt.err (!%p1068_p13)
}
 0x232   : > { %s1072_s7 = scalar_lea.hbm %s1380_s20, 768  ;;  %s1076_s27 = scalar_lea.hbm %s1431_s6, 1536 }
 0x233   : > { %p1073_p5 = scmp.ne.s32.totalorder %s1380_s20, %s1072_s7  ;;  %p1077_p8 = scmp.lt.s32.totalorder %s1380_s20, %s1431_s6 }
 0x234   : > { %p1078_p7 = scmp.lt.s32.totalorder %s1076_s27, %s1072_s7 }
 0x235   : > { %p1074_p0 = pnand %p1073_p5, %p1451_p10 }
 0x236   : > { %p1079_p11 = por %p1078_p7, %p1077_p8 }
 0x237   : > { %p1075_p4 = pneg %p1074_p0 }
 0x239   : > { %p1080_p1 = pnand %p1079_p11, %p1075_p4 }
 0x23b   : > { %1083 = shalt.err (!%p1080_p1)
}
 0x23c   : > { %s1144_s29 = smov 256   ;;  %s1145_s16 = smov 16  }
 0x23d   : > { %858 = dma.vmem_to_hbm [thread:$0]  (%p1451_p10), %s1382_s18, 768, %s1380_s20, %s620_s10, %s1144_s29, %s1144_s29, %s1145_s16  }
 0x23e PF: > { %s665_s25 = sand.u32 1, %s1118_s21   ;;  %p1452_p2 = scmp.ne.s32.totalorder %s1439_s28, 0 }
 0x23f   : > { %p1453_p6 = scmp.ge.s32.totalorder %s1130_s24, 2  ;;  %s666_s11 = scalar_lea.sflag [#allocation4], %s665_s25 }
 0x241   : > { %p873_p12 = pnand %p1453_p6, %p1452_p2 }
 0x243   : > { %p874_p3 = pneg %p873_p12 }
 0x245   : > { %1109 = dma.done.wait (%p874_p3), %s666_s11, 384  }
 0x246   : > { %1111 = vsyncadd (%p874_p3), %s666_s11, 4294966912  ;;  %s675_s12 = scalar_lea.sflag [#allocation10], %s665_s25 }
 0x247   : > { %1113 = dma.done.wait (%p874_p3), %s675_s12, 768  }
 0x248   : > { %1115 = vsyncadd (%p874_p3), %s675_s12, 4294966528  ;;  %p24_p10 = scmp.ge.s32.totalorder %s1256_s26, 4   ;;  %s1454_s21 = smov %s1122_s22 }
 0x249   : > { %s1455_s22 = smov %s1126_s23  ;;  %s1456_s23 = smov %s1265_s9 }
 0x24a   : > { %s1457_s24 = smov %s1256_s26  ;;  %26 = sbr.rel (!%p24_p10) target bundleno = 8 (0x8), region = 110 }
 0x24f   :  { %680 = vsyncpa [#allocation3], 1 }
 0x250   :  { %682 = vsyncpa [#allocation3 + $0x1], 1 }
 0x251   :  { %683 = vsyncpa [#allocation6], 1 }
 0x252   :  { %684 = vsyncpa [#allocation4], 1 }
 0x253   :  { %686 = vsyncpa [#allocation4 + $0x1], 1 }
 0x254   :  { %687 = vsyncpa [#allocation10], 1 }
 0x255   :  { %689 = vsyncpa [#allocation10 + $0x1], 1 }

</bundles_post_ra>
